<compile_context>
chip_gen: v6e
topology: v6e:2x2x1
jax: 0.10.0
libtpu: 0.0.40
codegen_flags: <defaults>
</compile_context>

<pallas_src>
import math
import functools

import jax
import jax.numpy as jnp
from jax import lax
from jax.experimental import pallas as pl
from jax.experimental.pallas import tpu as pltpu


# ---------------------------------------------------------------------------
# Hardware query (done once at import; falls back to v5e/v6e-like defaults).
# ---------------------------------------------------------------------------
def _vmem_capacity_bytes():
    try:
        return int(pltpu.get_tpu_info().vmem_capacity_bytes)
    except Exception:
        return 128 * 2**20


_VMEM_CAP = _vmem_capacity_bytes()
if _VMEM_CAP <= 64 * 2**20:
    # v7x-class: 64 MiB VMEM per TensorCore, 2 TCs/chip, very high HBM BW.
    _TM_CAP, _TN_CAP, _TK_CAP = 512, 512, 512
    _VMEM_FRAC = 0.75
    _TWO_CORE = True
else:
    # v5e / v6e: 128 MiB VMEM, single TensorCore.
    _TM_CAP, _TN_CAP, _TK_CAP = 512, 512, 1024
    _VMEM_FRAC = 0.80
    _TWO_CORE = False


# ---------------------------------------------------------------------------
# Kernels
# ---------------------------------------------------------------------------
def _linear_kernel_bias(x_ref, wt_ref, b_ref, o_ref, acc_ref):
    # x_ref: (tm, tk), wt_ref: (tk, tn) [weight already transposed to (K, N)],
    # b_ref: (1, tn), o_ref: (tm, tn), acc_ref: (tm, tn) f32 scratch.
    k = pl.program_id(2)

    @pl.when(k == 0)
    def _():
        # Fold the bias into the accumulator init -> trivial finalize.
        acc_ref[...] = jnp.broadcast_to(
            b_ref[...].astype(jnp.float32), acc_ref.shape)

    acc_ref[...] += jnp.dot(x_ref[...], wt_ref[...],
                            preferred_element_type=jnp.float32)

    @pl.when(k == pl.num_programs(2) - 1)
    def _():
        o_ref[...] = acc_ref[...].astype(o_ref.dtype)


def _linear_kernel_nobias(x_ref, wt_ref, o_ref, acc_ref):
    k = pl.program_id(2)

    @pl.when(k == 0)
    def _():
        acc_ref[...] = jnp.zeros_like(acc_ref)

    acc_ref[...] += jnp.dot(x_ref[...], wt_ref[...],
                            preferred_element_type=jnp.float32)

    @pl.when(k == pl.num_programs(2) - 1)
    def _():
        o_ref[...] = acc_ref[...].astype(o_ref.dtype)


# ---------------------------------------------------------------------------
# Tiling helpers
# ---------------------------------------------------------------------------
def _round_up(x, m):
    return ((x + m - 1) // m) * m


def _pick_tile(dim, align, cap):
    """Largest tile <= cap (multiple of `align`), preferring exact divisors of
    the aligned dim (=> zero extra padding), else fewest balanced chunks."""
    padded = _round_up(dim, align)
    if padded <= cap:
        return padded
    cap_a = (cap // align) * align
    t = cap_a
    while t >= align:
        if padded % t == 0 and t >= max(align, cap_a // 4):
            return t
        t -= align
    nchunks = -(-padded // cap_a)
    return _round_up(-(-padded // nchunks), align)


# ---------------------------------------------------------------------------
# One-time weight preparation (keep out of the per-call hot path).
# ---------------------------------------------------------------------------
def prepare_weight(weight):
    """PyTorch-layout (out_features, in_features) -> (in_features, out_features).

    Done once at param-load time so the kernel contracts K on the weight's
    major axis without any per-tile transpose/relayout.
    """
    return jnp.transpose(jnp.asarray(weight))


# ---------------------------------------------------------------------------
# Forward
# ---------------------------------------------------------------------------
@functools.partial(jax.jit, static_argnames=("use_bias", "cast_to_bf16"))
def linear_forward(x, weight_t, bias=None, *, use_bias=True,
                   cast_to_bf16=False):
    """y = x @ W.T + b, matching torch.nn.Linear semantics.

    x:        (..., in_features)
    weight_t: (in_features, out_features)  -- pre-transposed via prepare_weight
    bias:     (out_features,) or None
    """
    K, N = weight_t.shape
    lead_shape = x.shape[:-1]
    M = int(math.prod(lead_shape)) if lead_shape else 1
    assert x.shape[-1] == K

    out_dtype = x.dtype
    x2d = x.reshape(M, K)
    w2d = weight_t
    if cast_to_bf16 and x2d.dtype == jnp.float32:
        x2d = x2d.astype(jnp.bfloat16)
        w2d = w2d.astype(jnp.bfloat16)
    compute_dtype = x2d.dtype
    x_item = jnp.dtype(compute_dtype).itemsize
    w_item = jnp.dtype(w2d.dtype).itemsize
    o_item = jnp.dtype(out_dtype).itemsize

    # ---- tile selection (lane-dense, generation-aware caps) -----------------
    sub = 16 if compute_dtype == jnp.bfloat16 else 8
    tm = _pick_tile(M, sub, _TM_CAP)
    tn = _pick_tile(N, 128, _TN_CAP)
    tk = _pick_tile(K, 128, _TK_CAP)

    # On 2-TensorCore chips, make sure the parallel (i, j) grid has >= 2 blocks.
    if (_TWO_CORE
            and (_round_up(M, tm) // tm) * (_round_up(N, tn) // tn) == 1
            and _round_up(N, 128) >= 256):
        tn = _round_up(_round_up(N, 128) // 2, 128)

    # ---- VMEM budget check (rarely binds at these caps) ---------------------
    budget = int(_VMEM_CAP * _VMEM_FRAC)

    def _need(tm_, tn_, tk_, wbuf_):
        return (2 * tm_ * tk_ * x_item          # x tiles (double buffered)
                + wbuf_ * tk_ * tn_ * w_item     # weight tiles
                + 2 * 8 * tn_ * w_item           # bias tile (sublane padded)
                + 2 * tm_ * tn_ * o_item         # output tiles
                + tm_ * tn_ * 4)                 # f32 accumulator

    while _need(tm, tn, tk, 3) > budget and tk > 128:
        tk = max(128, (tk // 2) // 128 * 128)
    while _need(tm, tn, tk, 3) > budget and tn > 128:
        tn = max(128, (tn // 2) // 128 * 128)

    Mp, Kp, Np = _round_up(M, tm), _round_up(K, tk), _round_up(N, tn)
    gi, gj, gk = Mp // tm, Np // tn, Kp // tk
    grid = (gi, gj, gk)

    # Skinny-M (GEMV-like): HBM-bound on streaming W -> deepen W buffering.
    deep_w = (gi == 1) and (gj * gk >= 2)
    wbuf = 3 if deep_w else 2

    # ---- pad operands only when the shapes actually require it --------------
    if (Mp, Kp) != (M, K):
        x2d = jnp.pad(x2d, ((0, Mp - M), (0, Kp - K)))
    if (Kp, Np) != (K, N):
        w2d = jnp.pad(w2d, ((0, Kp - K), (0, Np - N)))

    vmem_limit = int(min(_VMEM_CAP * _VMEM_FRAC,
                         max(32 * 2**20, 2 * _need(tm, tn, tk, wbuf))))

    # Truthful cost estimate: x is re-streamed gj times, W is re-streamed gi
    # times, output written once.
    bytes_accessed = (Mp * Kp * x_item * gj
                      + Kp * Np * w_item * gi
                      + Mp * Np * o_item
                      + (Np * w_item if use_bias else 0))
    cost = pl.CostEstimate(flops=2 * Mp * Np * Kp, transcendentals=0,
                           bytes_accessed=int(bytes_accessed))
    cparams = pltpu.CompilerParams(
        dimension_semantics=("parallel", "parallel", "arbitrary"),
        vmem_limit_bytes=vmem_limit,
    )

    x_spec = pl.BlockSpec((tm, tk), lambda i, j, k: (i, k))
    w_idx = lambda i, j, k: (k, j)
    if deep_w:
        try:
            w_spec = pl.BlockSpec((tk, tn), w_idx, pipeline_mode=pl.Buffered(3))
        except TypeError:  # defensive: fall back to default double-buffering
            w_spec = pl.BlockSpec((tk, tn), w_idx)
    else:
        w_spec = pl.BlockSpec((tk, tn), w_idx)
    o_spec = pl.BlockSpec((tm, tn), lambda i, j, k: (i, j))
    scratch = [pltpu.VMEM((tm, tn), jnp.float32)]
    out_shape = jax.ShapeDtypeStruct((Mp, Np), out_dtype)

    if use_bias:
        b2d = bias.reshape(1, N).astype(w2d.dtype)
        if Np != N:
            b2d = jnp.pad(b2d, ((0, 0), (0, Np - N)))
        b_spec = pl.BlockSpec((1, tn), lambda i, j, k: (0, j))
        out2d = pl.pallas_call(
            _linear_kernel_bias,
            out_shape=out_shape,
            grid_spec=pltpu.PrefetchScalarGridSpec(
                num_scalar_prefetch=0,
                grid=grid,
                in_specs=[x_spec, w_spec, b_spec],
                out_specs=o_spec,
                scratch_shapes=scratch,
            ),
            compiler_params=cparams,
            cost_estimate=cost,
        )(x2d, w2d, b2d)
    else:
        out2d = pl.pallas_call(
            _linear_kernel_nobias,
            out_shape=out_shape,
            grid_spec=pltpu.PrefetchScalarGridSpec(
                num_scalar_prefetch=0,
                grid=grid,
                in_specs=[x_spec, w_spec],
                out_specs=o_spec,
                scratch_shapes=scratch,
            ),
            compiler_params=cparams,
            cost_estimate=cost,
        )(x2d, w2d)

    out2d = out2d[:M, :N]
    return out2d.reshape(*lead_shape, N)


# ---------------------------------------------------------------------------
# Init matching the PyTorch module: xavier_uniform_ weight, zeros bias.
# ---------------------------------------------------------------------------
def init_linear_params(key, in_features, out_features, bias=True,
                       dtype=jnp.float32):
    # xavier_uniform: U(-a, a), a = gain * sqrt(6 / (fan_in + fan_out)), gain=1
    a = math.sqrt(6.0 / (in_features + out_features))
    weight = jax.random.uniform(
        key, (out_features, in_features), dtype=dtype, minval=-a, maxval=a)
    b = jnp.zeros((out_features,), dtype=dtype) if bias else None
    return weight, b


if __name__ == "__main__":
    key = jax.random.PRNGKey(0)
    k_x, k_w, k_x2, k_w2 = jax.random.split(key, 4)

    # Small shapes consistent with the module's typical usage.
    batch, seq = 2, 8
    in_features, out_features = 32, 64

    x = jax.random.normal(k_x, (batch, seq, in_features), dtype=jnp.float32)
    weight, bias = init_linear_params(k_w, in_features, out_features, bias=True)
    weight_t = prepare_weight(weight)           # one-time (K, N) layout

    y = linear_forward(x, weight_t, bias, use_bias=True)
    jax.block_until_ready(y)
    y_ref = x @ weight.T + bias
    assert y.shape == (batch, seq, out_features)
    assert jnp.allclose(y, y_ref, atol=1e-5, rtol=1e-5)

    y_nb = linear_forward(x, weight_t, use_bias=False)
    jax.block_until_ready(y_nb)
    assert jnp.allclose(y_nb, x @ weight.T, atol=1e-5, rtol=1e-5)

    # Non-aligned, multi-K-step shape: exercises padding, K accumulation,
    # the skinny-M deep-buffering path and bias-folded init.
    M2, K2, N2 = 300, 1152, 384
    x2 = jax.random.normal(k_x2, (M2, K2), dtype=jnp.float32)
    w2, b2 = init_linear_params(k_w2, K2, N2, bias=True)
    w2_t = prepare_weight(w2)
    y2 = linear_forward(x2, w2_t, b2, use_bias=True)
    jax.block_until_ready(y2)
    y2_ref = jnp.dot(x2, w2.T, precision=lax.Precision.HIGHEST) + b2
    assert y2.shape == (M2, N2)
    assert jnp.allclose(y2, y2_ref, atol=1e-3, rtol=1e-3)

    print("KERNEL_OK")
</pallas_src>

<mosaic_0001>
module attributes {stable_mosaic.version = 11 : i64} {
  func.func @_linear_kernel_bias(%arg0: i32, %arg1: i32, %arg2: i32, %arg3: memref<16x128xf32, #tpu.memory_space<vmem>>, %arg4: memref<128x128xf32, #tpu.memory_space<vmem>>, %arg5: memref<1x128xf32, #tpu.memory_space<vmem>>, %arg6: memref<16x128xf32, #tpu.memory_space<vmem>>, %arg7: memref<16x128xf32, #tpu.memory_space<vmem>>) attributes {dimension_semantics = [#tpu.dimension_semantics<parallel>, #tpu.dimension_semantics<parallel>, #tpu.dimension_semantics<arbitrary>], iteration_bounds = array<i64: 1, 1, 1>, scalar_prefetch = 0 : i64, scratch_operands = 1 : i64, tpu.core_type = #tpu.core_type<tc>, window_params = [{transform_indices = @transform_0, window_bounds = array<i64: 16, 128>}, {transform_indices = @transform_1, window_bounds = array<i64: 128, 128>}, {transform_indices = @transform_2, window_bounds = array<i64: 1, 128>}, {transform_indices = @transform_3, window_bounds = array<i64: 16, 128>}]} {
    %c0_i32 = arith.constant 0 : i32
    %0 = arith.cmpi eq, %arg2, %c0_i32 : i32
    %1 = arith.extui %0 : i1 to i32
    %c0_i32_0 = arith.constant 0 : i32
    %2 = arith.cmpi ne, %1, %c0_i32_0 : i32
    scf.if %2 {
      %c0_10 = arith.constant 0 : index
      %c0_11 = arith.constant 0 : index
      %12 = vector.load %arg5[%c0_10, %c0_11] : memref<1x128xf32, #tpu.memory_space<vmem>>, vector<1x128xf32>
      %13 = vector.shape_cast %12 : vector<1x128xf32> to vector<1x128xf32>
      %14 = vector.broadcast %13 : vector<1x128xf32> to vector<16x128xf32>
      %c0_12 = arith.constant 0 : index
      %c0_13 = arith.constant 0 : index
      %15 = vector.load %arg7[%c0_12, %c0_13] : memref<16x128xf32, #tpu.memory_space<vmem>>, vector<16x128xf32>
      tpu.vector_store %arg7[%c0_12, %c0_13], %14 {strides = array<i32>} : memref<16x128xf32, #tpu.memory_space<vmem>>, vector<16x128xf32>,
    } else {
    }
    %c0 = arith.constant 0 : index
    %c0_1 = arith.constant 0 : index
    %3 = vector.load %arg7[%c0, %c0_1] : memref<16x128xf32, #tpu.memory_space<vmem>>, vector<16x128xf32>
    %c0_2 = arith.constant 0 : index
    %c0_3 = arith.constant 0 : index
    %4 = vector.load %arg3[%c0_2, %c0_3] : memref<16x128xf32, #tpu.memory_space<vmem>>, vector<16x128xf32>
    %c0_4 = arith.constant 0 : index
    %c0_5 = arith.constant 0 : index
    %5 = vector.load %arg4[%c0_4, %c0_5] : memref<128x128xf32, #tpu.memory_space<vmem>>, vector<128x128xf32>
    %cst = arith.constant dense<0.000000e+00> : vector<16x128xf32>
    %6 = tpu.matmul %4, %5, %cst {dimension_numbers = #tpu.dot_dimension_numbers<[1], [0], [0], [1], [0, 0, 1, 1], [], []>} : vector<16x128xf32>, vector<128x128xf32>, vector<16x128xf32> -> vector<16x128xf32>
    %7 = arith.addf %3, %6 : vector<16x128xf32>
    %c0_6 = arith.constant 0 : index
    %c0_7 = arith.constant 0 : index
    %8 = vector.load %arg7[%c0_6, %c0_7] : memref<16x128xf32, #tpu.memory_space<vmem>>, vector<16x128xf32>
    tpu.vector_store %arg7[%c0_6, %c0_7], %7 {strides = array<i32>} : memref<16x128xf32, #tpu.memory_space<vmem>>, vector<16x128xf32>,
    %c0_i32_8 = arith.constant 0 : i32
    %9 = arith.cmpi eq, %arg2, %c0_i32_8 : i32
    %10 = arith.extui %9 : i1 to i32
    %c0_i32_9 = arith.constant 0 : i32
    %11 = arith.cmpi ne, %10, %c0_i32_9 : i32
    scf.if %11 {
      %c0_10 = arith.constant 0 : index
      %c0_11 = arith.constant 0 : index
      %12 = vector.load %arg7[%c0_10, %c0_11] : memref<16x128xf32, #tpu.memory_space<vmem>>, vector<16x128xf32>
      %c0_12 = arith.constant 0 : index
      %c0_13 = arith.constant 0 : index
      %13 = vector.load %arg6[%c0_12, %c0_13] : memref<16x128xf32, #tpu.memory_space<vmem>>, vector<16x128xf32>
      tpu.vector_store %arg6[%c0_12, %c0_13], %12 {strides = array<i32>} : memref<16x128xf32, #tpu.memory_space<vmem>>, vector<16x128xf32>,
    } else {
    }
    return
  }
  func.func @transform_0(%arg0: i32, %arg1: i32, %arg2: i32) -> (i32, i32) {
    %c0_i32 = arith.constant 0 : i32
    return %arg0, %arg2 : i32, i32
  }
  func.func @transform_1(%arg0: i32, %arg1: i32, %arg2: i32) -> (i32, i32) {
    %c0_i32 = arith.constant 0 : i32
    return %arg2, %arg1 : i32, i32
  }
  func.func @transform_2(%arg0: i32, %arg1: i32, %arg2: i32) -> (i32, i32) {
    %c0_i32 = arith.constant 0 : i32
    %c0_i32_0 = arith.constant 0 : i32
    return %c0_i32, %arg1 : i32, i32
  }
  func.func @transform_3(%arg0: i32, %arg1: i32, %arg2: i32) -> (i32, i32) {
    %c0_i32 = arith.constant 0 : i32
    return %arg0, %arg1 : i32, i32
  }
}

</mosaic_0001>

<bundles_post_ra>
// kernel: linear_forward.1
= control target key start
LH: loop header
LB: loop body
LE: loop exit
PB: predicated region body
PF: predicated region fallthrough
CT: control target
= control target key end

     0   :  { %s274_s1 = inlined_call_operand.vmem [shape: f32[128,128], index: 1, kind: input, shape index: {}]   ;;  %s275_s0 = inlined_call_operand.vmem [shape: f32[16,128], index: 0, kind: input, shape index: {}]   ;;  %s276_s2 = inlined_call_operand.vmem [shape: f32[1,128], index: 2, kind: input, shape index: {}]   ;;  %s277_s3 = inlined_call_operand.vmem [shape: f32[16,128], index: 3, kind: output, shape index: {}]  }
   0x1   :  { %v46_v0 = vld [vmem:[%s274_s1 + $0x78] sm:$0xff]  ;;  %v45_v1 = vld [vmem:[%s274_s1 + $0x70] sm:$0xff]  ;;  %v44_v2 = vld [vmem:[%s274_s1 + $0x68] sm:$0xff] }
   0x2   :  { %156 = vmatprep.subr.mxu0 %v46_v0  ;;  %v43_v3 = vld [vmem:[%s274_s1 + $0x60] sm:$0xff]  ;;  %v42_v5 = vld [vmem:[%s274_s1 + $0x58] sm:$0xff]  ;;  %v41_v6 = vld [vmem:[%s274_s1 + $0x50] sm:$0xff] }
   0x3   :  { %157 = vmatpush3.msra.mxu0 %v46_v0  ;;  %v29_v4 = vld [vmem:[%s275_s0] sm:$0xff]  ;;  %v40_v7 = vld [vmem:[%s274_s1 + $0x48] sm:$0xff]  ;;  %v38_v9 = vld [vmem:[%s274_s1 + $0x38] sm:$0xff] }
   0x4   :  { %158 = vmatprep.subr.mxu0 %v45_v1  ;;  %188 = vmatprep.mubr.f32.mxu0 %v29_v4  ;;  %v39_v8 = vld [vmem:[%s274_s1 + $0x40] sm:$0xff]  ;;  %v37_v10 = vld [vmem:[%s274_s1 + $0x30] sm:$0xff]  ;;  %v36_v11 = vld [vmem:[%s274_s1 + $0x28] sm:$0xff] }
   0x5   :  { %159 = vmatpush3.msra.mxu0 %v45_v1  ;;  %v35_v12 = vld [vmem:[%s274_s1 + $0x20] sm:$0xff]  ;;  %v34_v13 = vld [vmem:[%s274_s1 + $0x18] sm:$0xff]  ;;  %v33_v14 = vld [vmem:[%s274_s1 + $0x10] sm:$0xff] }
   0x6   :  { %160 = vmatprep.subr.mxu0 %v44_v2  ;;  %v32_v15 = vld [vmem:[%s274_s1 + $0x8] sm:$0xff]  ;;  %v31_v16 = vld [vmem:[%s274_s1] sm:$0xff] }
   0x7   :  { %161 = vmatpush3.msra.mxu0 %v44_v2  ;;  %v30_v17 = vld [vmem:[%s275_s0 + $0x8] sm:$0xff]  ;;  %v137_v18 = vld [vmem:[%s276_s2] ss:$0 sm:$0xff] }
   0x8   :  { %162 = vmatprep.subr.mxu0 %v43_v3 }
   0x9   :  { %163 = vmatpush3.msra.mxu0 %v43_v3 }
   0xa   :  { %164 = vmatprep.subr.mxu0 %v42_v5 }
   0xb   :  { %165 = vmatpush3.msra.mxu0 %v42_v5 }
   0xc   :  { %166 = vmatprep.subr.mxu0 %v41_v6 }
   0xd   :  { %167 = vmatpush3.msra.mxu0 %v41_v6 }
   0xe   :  { %168 = vmatprep.subr.mxu0 %v40_v7 }
   0xf   :  { %169 = vmatpush3.msra.mxu0 %v40_v7 }
  0x10   :  { %170 = vmatprep.subr.mxu0 %v39_v8 }
  0x11   :  { %171 = vmatpush3.msra.mxu0 %v39_v8 }
  0x12   :  { %172 = vmatprep.subr.mxu0 %v38_v9 }
  0x13   :  { %173 = vmatpush3.msra.mxu0 %v38_v9 }
  0x14   :  { %174 = vmatprep.subr.mxu0 %v37_v10 }
  0x15   :  { %175 = vmatpush3.msra.mxu0 %v37_v10 }
  0x16   :  { %176 = vmatprep.subr.mxu0 %v36_v11 }
  0x17   :  { %177 = vmatpush3.msra.mxu0 %v36_v11 }
  0x18   :  { %178 = vmatprep.subr.mxu0 %v35_v12 }
  0x19   :  { %179 = vmatpush3.msra.mxu0 %v35_v12 }
  0x1a   :  { %180 = vmatprep.subr.mxu0 %v34_v13 }
  0x1b   :  { %181 = vmatpush3.msra.mxu0 %v34_v13 }
  0x1c   :  { %182 = vmatprep.subr.mxu0 %v33_v14 }
  0x1d   :  { %183 = vmatpush3.msra.mxu0 %v33_v14 }
  0x1e   :  { %184 = vmatprep.subr.mxu0 %v32_v15 }
  0x1f   :  { %185 = vmatpush3.msra.mxu0 %v32_v15 }
  0x20   :  { %186 = vmatprep.subr.mxu0 %v31_v16 }
  0x21   :  { %187 = vmatpush3.msra.mxu0 %v31_v16 }
  0x22   :  { %189 = vmatmul.mubr.f32.vlgmr.msra.gmra.mxu0 %v30_v17 }
  0xe2   :  { %v190_v19 = vpop.f32.mrf.mxu0 }
  0xe3   :  { %v123_v20 = vadd.f32 %v190_v19, %v137_v18 }
  0xe4   :  { %v113_v21 = vpop.f32.mrf.mxu0 }
  0xe5   :  { %132 = vst [vmem:[%s277_s3 + $0x8] sm:$0xff] %v123_v20  ;;  %v122_v22 = vadd.f32 %v137_v18, %v113_v21 }
  0xe7   :  { %131 = vst [vmem:[%s277_s3] sm:$0xff] %v122_v22 }

</bundles_post_ra>
